<compile_context>
chip_gen: v6e
topology: v6e:2x2x1
jax: 0.10.0
libtpu: 0.0.40
codegen_flags: <defaults>
</compile_context>

<pallas_src>
import functools

import jax
import jax.numpy as jnp
from jax.experimental import pallas as pl
from jax.experimental.pallas import tpu as pltpu

BN_EPS = 1e-5
LANE = 128


def _round_up(n, m):
    return ((n + m - 1) // m) * m


def _cdiv(a, b):
    return -(-a // b)


def _num_tensorcores_per_chip():
    """Best-effort TensorCores-per-chip detection (v7x: 2, v5e/v6e: 1)."""
    try:
        d = jax.devices()[0]
        kind = str(getattr(d, "device_kind", "")).lower().replace(" ", "")
        if "v7" in kind or "tpu7" in kind:
            return 2
        nc = getattr(d, "num_cores", None)
        if isinstance(nc, int) and nc > 0:
            return nc
    except Exception:
        pass
    return 1


# ----------------------------- Pallas kernel -------------------------------- #

def _make_mlp_kernel(num_hidden):
    """Fused MLP kernel for one batch tile.

    refs = [x_ref, w0, b0, w1, b1, ..., w_out, b_out, o_ref]
    Hidden layers: h = relu(h @ w + b)   (BN already folded into w, b; f32 accumulate)
    Output layer:  o = h @ w_out + b_out
    Intermediate activations never leave VMEM/vregs.
    """

    def kernel(*refs):
        x_ref = refs[0]
        o_ref = refs[-1]
        wb = refs[1:-1]

        # cast to compute dtype in-kernel (VPU op hidden under the first matmul push)
        h = x_ref[...].astype(wb[0].dtype)
        for l in range(num_hidden):
            w_ref = wb[2 * l]
            b_ref = wb[2 * l + 1]
            y = jnp.dot(h, w_ref[...], preferred_element_type=jnp.float32)
            y = jnp.maximum(y + b_ref[...], 0.0)       # bias + folded BN + ReLU in f32
            h = y.astype(w_ref.dtype)                  # back to compute dtype for MXU
        w_ref = wb[-2]
        b_ref = wb[-1]
        y = jnp.dot(h, w_ref[...], preferred_element_type=jnp.float32)
        o_ref[...] = y + b_ref[...]

    return kernel


# ----------------------------- host-side packing ----------------------------- #

def fold_and_pad_params(raw_params, compute_dtype=jnp.bfloat16):
    """Fold eval-mode BN into the Linear weights/bias and pad feature dims.

    First layer's K (input size) stays UNPADDED (so x needs no feature padding);
    every output dim and every subsequent K is zero-padded to a multiple of 128.
    Zero padding keeps the math exact: padded weight rows/columns and biases are 0,
    so padded hidden columns stay exactly 0 through ReLU.

    Returns [(w_padded(Kp, Np) in compute_dtype, b_padded(1, Np) float32), ...]
    """
    hidden, (w_out, b_out) = raw_params
    folded = []
    for p in hidden:
        scale = p["gamma"] / jnp.sqrt(p["running_var"] + BN_EPS)
        shift = p["beta"] - p["running_mean"] * scale
        folded.append((p["w"] * scale[None, :],       # fold BN scale into weight cols
                       p["b"] * scale + shift))       # fold BN shift into bias
    folded.append((w_out, b_out))

    packed = []
    prev_out_p = folded[0][0].shape[0]                # first layer K = true input size
    for w, b in folded:
        din, dout = w.shape
        din_p = prev_out_p
        dout_p = _round_up(dout, LANE)
        wp = jnp.pad(w, ((0, din_p - din), (0, dout_p - dout))).astype(compute_dtype)
        bp_ = jnp.pad(b, (0, dout_p - dout)).reshape(1, dout_p).astype(jnp.float32)
        packed.append((wp, bp_))
        prev_out_p = dout_p
    return packed


# ----------------------------- forward wrapper ------------------------------- #

@functools.partial(jax.jit, static_argnames=("num_classes", "tm_max", "num_tc"))
def mlp_forward(x, packed, *, num_classes, tm_max=512, num_tc=None):
    """Run the fused MLP kernel. `packed` comes from fold_and_pad_params."""
    B, din = x.shape
    assert packed[0][0].shape[0] == din, "first-layer weight K must equal input size"
    compute_dtype = packed[0][0].dtype
    dout_p = packed[-1][0].shape[1]
    num_hidden = len(packed) - 1

    if num_tc is None:
        num_tc = _num_tensorcores_per_chip()

    # batch tiling: tm multiple of the sublane packing (16 for bf16, 8 for f32),
    # fewest grid steps that fit tm_max on 1-TC chips, an even split on multi-TC
    # chips, and sized to minimize batch over-padding.
    sublane = 32 // int(compute_dtype.itemsize)
    bp0 = _round_up(B, sublane)
    steps = max(_cdiv(bp0, tm_max), 1)
    if num_tc > 1:
        steps = _round_up(max(steps, num_tc), num_tc)
    tm = min(_round_up(_cdiv(bp0, steps), sublane), bp0)
    bp_final = _round_up(bp0, tm)
    grid = (bp_final // tm,)

    # pad batch rows only when needed; feature dim stays unpadded, cast is in-kernel.
    x_in = x if bp_final == B else jnp.pad(x, ((0, bp_final - B), (0, 0)))

    # single-buffer the grid-constant weight/bias blocks only once double buffering
    # them would actually cost meaningful VMEM (matters on v7x's 64 MiB per TC).
    weight_bytes = sum(int(w.size) * int(w.dtype.itemsize) +
                       int(b.size) * int(b.dtype.itemsize) for w, b in packed)
    wb_kwargs = {"pipeline_mode": pl.Buffered(1)} if weight_bytes > (8 << 20) else {}

    in_specs = [pl.BlockSpec((tm, din), lambda i: (i, 0))]   # x with true feature dim
    flat_args = [x_in]
    for w, b in packed:
        in_specs.append(pl.BlockSpec(w.shape, lambda i: (0, 0), **wb_kwargs))
        in_specs.append(pl.BlockSpec(b.shape, lambda i: (0, 0), **wb_kwargs))
        flat_args.append(w)
        flat_args.append(b)

    flops = 0
    bytes_accessed = int(x_in.size) * int(x_in.dtype.itemsize) + bp_final * dout_p * 4
    for w, b in packed:
        flops += 2 * bp_final * int(w.shape[0]) * int(w.shape[1])
        bytes_accessed += (int(w.size) * int(w.dtype.itemsize)
                           + int(b.size) * int(b.dtype.itemsize))

    out = pl.pallas_call(
        _make_mlp_kernel(num_hidden),
        out_shape=jax.ShapeDtypeStruct((bp_final, dout_p), jnp.float32),
        grid_spec=pltpu.PrefetchScalarGridSpec(
            num_scalar_prefetch=0,
            grid=grid,
            in_specs=in_specs,
            out_specs=pl.BlockSpec((tm, dout_p), lambda i: (i, 0)),
        ),
        compiler_params=pltpu.CompilerParams(
            dimension_semantics=("parallel",)),
        cost_estimate=pl.CostEstimate(flops=flops, transcendentals=0,
                                      bytes_accessed=bytes_accessed),
    )(*flat_args)

    return out[:B, :num_classes]


# ----------------------------- parameters / reference ------------------------ #

def init_params(key, input_size, hidden_sizes, num_classes):
    """Raw (PyTorch-like) params: Linear w/b + BatchNorm gamma/beta/running stats."""
    hidden = []
    prev = input_size
    for h in hidden_sizes:
        key, k_w, k_b, k_rm, k_rv = jax.random.split(key, 5)
        bound = 1.0 / jnp.sqrt(prev)
        w = jax.random.uniform(k_w, (prev, h), jnp.float32, -bound, bound)  # stored as W^T
        b = jax.random.uniform(k_b, (h,), jnp.float32, -bound, bound)
        hidden.append(dict(
            w=w, b=b,
            gamma=jnp.ones((h,), jnp.float32),
            beta=jnp.zeros((h,), jnp.float32),
            running_mean=0.1 * jax.random.normal(k_rm, (h,), jnp.float32),
            running_var=1.0 + 0.1 * jax.random.uniform(k_rv, (h,), jnp.float32),
        ))
        prev = h
    key, k_w, k_b = jax.random.split(key, 3)
    bound = 1.0 / jnp.sqrt(prev)
    w_out = jax.random.uniform(k_w, (prev, num_classes), jnp.float32, -bound, bound)
    b_out = jax.random.uniform(k_b, (num_classes,), jnp.float32, -bound, bound)
    return hidden, (w_out, b_out)


def reference_forward(x, raw_params):
    """Pure-JAX eval-mode forward, mirroring the PyTorch module layer by layer."""
    hidden, (w_out, b_out) = raw_params
    h = x
    for p in hidden:
        h = h @ p["w"] + p["b"]
        scale = p["gamma"] / jnp.sqrt(p["running_var"] + BN_EPS)
        h = (h - p["running_mean"]) * scale + p["beta"]
        h = jnp.maximum(h, 0.0)
        # Dropout: identity in eval mode
    return h @ w_out + b_out


# ----------------------------------- main ------------------------------------ #

if __name__ == "__main__":
    key = jax.random.PRNGKey(0)
    key, k_x, k_p = jax.random.split(key, 3)

    batch = 256
    input_size = 16
    hidden_sizes = [32, 32]
    num_classes = 4

    x = jax.random.normal(k_x, (batch, input_size), jnp.float32)
    raw_params = init_params(k_p, input_size, hidden_sizes, num_classes)
    ref = reference_forward(x, raw_params)

    # float32 path (exact check)
    packed_f32 = fold_and_pad_params(raw_params, compute_dtype=jnp.float32)
    out_f32 = mlp_forward(x, packed_f32, num_classes=num_classes)
    out_f32 = jax.block_until_ready(out_f32)
    assert out_f32.shape == (batch, num_classes)
    assert jnp.allclose(out_f32, ref, atol=1e-4, rtol=1e-4), "f32 mismatch vs. reference"

    # bf16 default path (bf16 MXU on every generation, f32 accumulation)
    packed_bf16 = fold_and_pad_params(raw_params)          # bf16 by default
    out_bf16 = mlp_forward(x, packed_bf16, num_classes=num_classes)
    out_bf16 = jax.block_until_ready(out_bf16)
    assert jnp.allclose(out_bf16, ref, atol=1e-1, rtol=1e-1), "bf16 mismatch vs. reference"

    # ragged batch (exercises padding-aware tm / row padding path)
    x_small = x[:100]
    ref_small = reference_forward(x_small, raw_params)
    out_small = mlp_forward(x_small, packed_bf16, num_classes=num_classes)
    out_small = jax.block_until_ready(out_small)
    assert out_small.shape == (100, num_classes)
    assert jnp.allclose(out_small, ref_small, atol=1e-1, rtol=1e-1), "ragged-batch mismatch"

    print("KERNEL_OK")
</pallas_src>

<mosaic_0001>
module attributes {stable_mosaic.version = 11 : i64} {
  func.func @kernel(%arg0: i32, %arg1: memref<256x16xf32, #tpu.memory_space<vmem>>, %arg2: memref<16x128xf32, #tpu.memory_space<vmem>>, %arg3: memref<1x128xf32, #tpu.memory_space<vmem>>, %arg4: memref<128x128xf32, #tpu.memory_space<vmem>>, %arg5: memref<1x128xf32, #tpu.memory_space<vmem>>, %arg6: memref<128x128xf32, #tpu.memory_space<vmem>>, %arg7: memref<1x128xf32, #tpu.memory_space<vmem>>, %arg8: memref<256x128xf32, #tpu.memory_space<vmem>>) attributes {dimension_semantics = [#tpu.dimension_semantics<parallel>], iteration_bounds = array<i64: 1>, scalar_prefetch = 0 : i64, scratch_operands = 0 : i64, tpu.core_type = #tpu.core_type<tc>, window_params = [{transform_indices = @transform_0, window_bounds = array<i64: 256, 16>}, {pipeline_mode = #tpu.pipeline_mode<synchronous>, transform_indices = @transform_1, window_bounds = array<i64: 16, 128>}, {pipeline_mode = #tpu.pipeline_mode<synchronous>, transform_indices = @transform_2, window_bounds = array<i64: 1, 128>}, {pipeline_mode = #tpu.pipeline_mode<synchronous>, transform_indices = @transform_3, window_bounds = array<i64: 128, 128>}, {pipeline_mode = #tpu.pipeline_mode<synchronous>, transform_indices = @transform_4, window_bounds = array<i64: 1, 128>}, {pipeline_mode = #tpu.pipeline_mode<synchronous>, transform_indices = @transform_5, window_bounds = array<i64: 128, 128>}, {pipeline_mode = #tpu.pipeline_mode<synchronous>, transform_indices = @transform_6, window_bounds = array<i64: 1, 128>}, {transform_indices = @transform_7, window_bounds = array<i64: 256, 128>}]} {
    %c0 = arith.constant 0 : index
    %c0_0 = arith.constant 0 : index
    %0 = vector.load %arg1[%c0, %c0_0] : memref<256x16xf32, #tpu.memory_space<vmem>>, vector<256x16xf32>
    %c0_1 = arith.constant 0 : index
    %c0_2 = arith.constant 0 : index
    %1 = vector.load %arg2[%c0_1, %c0_2] : memref<16x128xf32, #tpu.memory_space<vmem>>, vector<16x128xf32>
    %cst = arith.constant dense<0.000000e+00> : vector<256x128xf32>
    %2 = tpu.matmul %0, %1, %cst {dimension_numbers = #tpu.dot_dimension_numbers<[1], [0], [0], [1], [0, 0, 1, 1], [], []>} : vector<256x16xf32>, vector<16x128xf32>, vector<256x128xf32> -> vector<256x128xf32>
    %c0_3 = arith.constant 0 : index
    %c0_4 = arith.constant 0 : index
    %3 = vector.load %arg3[%c0_3, %c0_4] : memref<1x128xf32, #tpu.memory_space<vmem>>, vector<1x128xf32>
    %4 = vector.broadcast %3 : vector<1x128xf32> to vector<256x128xf32>
    %5 = arith.addf %2, %4 : vector<256x128xf32>
    %cst_5 = arith.constant 0.000000e+00 : f32
    %6 = vector.broadcast %cst_5 : f32 to vector<256x128xf32>
    %7 = arith.maximumf %5, %6 : vector<256x128xf32>
    %c0_6 = arith.constant 0 : index
    %c0_7 = arith.constant 0 : index
    %8 = vector.load %arg4[%c0_6, %c0_7] : memref<128x128xf32, #tpu.memory_space<vmem>>, vector<128x128xf32>
    %cst_8 = arith.constant dense<0.000000e+00> : vector<256x128xf32>
    %9 = tpu.matmul %7, %8, %cst_8 {dimension_numbers = #tpu.dot_dimension_numbers<[1], [0], [0], [1], [0, 0, 1, 1], [], []>} : vector<256x128xf32>, vector<128x128xf32>, vector<256x128xf32> -> vector<256x128xf32>
    %c0_9 = arith.constant 0 : index
    %c0_10 = arith.constant 0 : index
    %10 = vector.load %arg5[%c0_9, %c0_10] : memref<1x128xf32, #tpu.memory_space<vmem>>, vector<1x128xf32>
    %11 = vector.broadcast %10 : vector<1x128xf32> to vector<256x128xf32>
    %12 = arith.addf %9, %11 : vector<256x128xf32>
    %cst_11 = arith.constant 0.000000e+00 : f32
    %13 = vector.broadcast %cst_11 : f32 to vector<256x128xf32>
    %14 = arith.maximumf %12, %13 : vector<256x128xf32>
    %c0_12 = arith.constant 0 : index
    %c0_13 = arith.constant 0 : index
    %15 = vector.load %arg6[%c0_12, %c0_13] : memref<128x128xf32, #tpu.memory_space<vmem>>, vector<128x128xf32>
    %cst_14 = arith.constant dense<0.000000e+00> : vector<256x128xf32>
    %16 = tpu.matmul %14, %15, %cst_14 {dimension_numbers = #tpu.dot_dimension_numbers<[1], [0], [0], [1], [0, 0, 1, 1], [], []>} : vector<256x128xf32>, vector<128x128xf32>, vector<256x128xf32> -> vector<256x128xf32>
    %c0_15 = arith.constant 0 : index
    %c0_16 = arith.constant 0 : index
    %17 = vector.load %arg7[%c0_15, %c0_16] : memref<1x128xf32, #tpu.memory_space<vmem>>, vector<1x128xf32>
    %18 = vector.broadcast %17 : vector<1x128xf32> to vector<256x128xf32>
    %19 = arith.addf %16, %18 : vector<256x128xf32>
    %c0_17 = arith.constant 0 : index
    %c0_18 = arith.constant 0 : index
    %20 = vector.load %arg8[%c0_17, %c0_18] : memref<256x128xf32, #tpu.memory_space<vmem>>, vector<256x128xf32>
    tpu.vector_store %arg8[%c0_17, %c0_18], %19 {strides = array<i32>} : memref<256x128xf32, #tpu.memory_space<vmem>>, vector<256x128xf32>,
    return
  }
  func.func @transform_0(%arg0: i32) -> (i32, i32) {
    %c0_i32 = arith.constant 0 : i32
    %c0_i32_0 = arith.constant 0 : i32
    return %arg0, %c0_i32 : i32, i32
  }
  func.func @transform_1(%arg0: i32) -> (i32, i32) {
    %c0_i32 = arith.constant 0 : i32
    %c0_i32_0 = arith.constant 0 : i32
    %c0_i32_1 = arith.constant 0 : i32
    return %c0_i32, %c0_i32_0 : i32, i32
  }
  func.func @transform_2(%arg0: i32) -> (i32, i32) {
    %c0_i32 = arith.constant 0 : i32
    %c0_i32_0 = arith.constant 0 : i32
    %c0_i32_1 = arith.constant 0 : i32
    return %c0_i32, %c0_i32_0 : i32, i32
  }
  func.func @transform_3(%arg0: i32) -> (i32, i32) {
    %c0_i32 = arith.constant 0 : i32
    %c0_i32_0 = arith.constant 0 : i32
    %c0_i32_1 = arith.constant 0 : i32
    return %c0_i32, %c0_i32_0 : i32, i32
  }
  func.func @transform_4(%arg0: i32) -> (i32, i32) {
    %c0_i32 = arith.constant 0 : i32
    %c0_i32_0 = arith.constant 0 : i32
    %c0_i32_1 = arith.constant 0 : i32
    return %c0_i32, %c0_i32_0 : i32, i32
  }
  func.func @transform_5(%arg0: i32) -> (i32, i32) {
    %c0_i32 = arith.constant 0 : i32
    %c0_i32_0 = arith.constant 0 : i32
    %c0_i32_1 = arith.constant 0 : i32
    return %c0_i32, %c0_i32_0 : i32, i32
  }
  func.func @transform_6(%arg0: i32) -> (i32, i32) {
    %c0_i32 = arith.constant 0 : i32
    %c0_i32_0 = arith.constant 0 : i32
    %c0_i32_1 = arith.constant 0 : i32
    return %c0_i32, %c0_i32_0 : i32, i32
  }
  func.func @transform_7(%arg0: i32) -> (i32, i32) {
    %c0_i32 = arith.constant 0 : i32
    %c0_i32_0 = arith.constant 0 : i32
    return %arg0, %c0_i32 : i32, i32
  }
}

</mosaic_0001>

<bundles_post_ra>
// kernel: mlp_forward.1
= control target key start
LH: loop header
LB: loop body
LE: loop exit
PB: predicated region body
PF: predicated region fallthrough
CT: control target
= control target key end

     0   :  { %vm67_vm0 = vcmask 130048   ;;  %s1852_s1 = inlined_call_operand.vmem [shape: f32[16,128], index: 1, kind: input, shape index: {}]   ;;  %s1853_s0 = inlined_call_operand.vmem [shape: f32[256,16], index: 0, kind: input, shape index: {}]   ;;  %s1854_s3 = inlined_call_operand.vmem [shape: f32[128,128], index: 3, kind: input, shape index: {}]   ;;  %s1855_s5 = inlined_call_operand.vmem [shape: f32[128,128], index: 5, kind: input, shape index: {}]   ;;  %s1856_s2 = inlined_call_operand.vmem [shape: f32[1,128], index: 2, kind: input, shape index: {}]   ;;  %s1857_s4 = inlined_call_operand.vmem [shape: f32[1,128], index: 4, kind: input, shape index: {}]   ;;  %s1858_s6 = inlined_call_operand.vmem [shape: f32[1,128], index: 6, kind: input, shape index: {}]   ;;  %s1859_s7 = inlined_call_operand.vmem [shape: f32[256,128], index: 7, kind: output, shape index: {}]  }
   0x1   :  { %v59_v0 = vld [vmem:[%s1852_s1 + $0x8] sm:$0xff]  ;;  %v58_v1 = vld [vmem:[%s1852_s1] sm:$0xff]  ;;  %v28_v4 = vld [vmem:[%s1853_s0 + $0x10] sm:$0xff] }
   0x2   :  { %v26_v2 = vld [vmem:[%s1853_s0] sm:$0xff]  ;;  %1150 = vmatprep.subr.mxu0 %v59_v0  ;;  %v27_v3 = vld [vmem:[%s1853_s0 + $0x8] sm:$0xff]  ;;  %1362 = vmatprep.subr.mxu1 %v59_v0  ;;  %v29_v5 = vld [vmem:[%s1853_s0 + $0x18] sm:$0xff] }
   0x3   :  { %1154 = vmatprep.mubr.msk.f32.mxu0 %vm67_vm0, %v26_v2  ;;  %1151 = vmatpush3.msra.mxu0 %v59_v0  ;;  %v42_v6 = vld [vmem:[%s1853_s0 + $0x80] sm:$0xff]  ;;  %v43_v7 = vld [vmem:[%s1853_s0 + $0x88] sm:$0xff]  ;;  %v44_v8 = vld [vmem:[%s1853_s0 + $0x90] sm:$0xff] }
   0x4   :  { %1152 = vmatprep.subr.mxu0 %v58_v1  ;;  %1364 = vmatpush3.msra.mxu1 %v59_v0  ;;  %v30_v9 = vld [vmem:[%s1853_s0 + $0x20] sm:$0xff]  ;;  %v45_v10 = vld [vmem:[%s1853_s0 + $0x98] sm:$0xff]  ;;  %v31_v11 = vld [vmem:[%s1853_s0 + $0x28] sm:$0xff] }
   0x5   :  { %1153 = vmatpush3.msra.mxu0 %v58_v1  ;;  %1363 = vmatprep.subr.mxu1 %v58_v1  ;;  %v46_v12 = vld [vmem:[%s1853_s0 + $0xa0] sm:$0xff]  ;;  %v32_v13 = vld [vmem:[%s1853_s0 + $0x30] sm:$0xff]  ;;  %v436_v14 = vld [vmem:[%s1854_s3 + $0x78] sm:$0xff] }
   0x6   :  { %1155 = vmatmul.mubr.msk.f32.vlgmr.msra.gmra.mxu0 %vm67_vm0, %v27_v3  ;;  %1365 = vmatpush3.msra.mxu1 %v58_v1  ;;  %v435_v15 = vld [vmem:[%s1854_s3 + $0x70] sm:$0xff]  ;;  %v47_v16 = vld [vmem:[%s1853_s0 + $0xa8] sm:$0xff]  ;;  %v33_v17 = vld [vmem:[%s1853_s0 + $0x38] sm:$0xff] }
   0x7   :  { %1157 = vmatprep.mubr.msk.f32.mxu0 %vm67_vm0, %v28_v4  ;;  %1178 = vmatprep.mubr.msk.f32.mxu1 %vm67_vm0, %v42_v6  ;;  %v48_v18 = vld [vmem:[%s1853_s0 + $0xb0] sm:$0xff]  ;;  %v34_v19 = vld [vmem:[%s1853_s0 + $0x40] sm:$0xff]  ;;  %v434_v20 = vld [vmem:[%s1854_s3 + $0x68] sm:$0xff] }
   0x8   :  { %1179 = vmatmul.mubr.msk.f32.vlgmr.msra.gmra.mxu1 %vm67_vm0, %v43_v7  ;;  %1202 = vmatprep.subr.mxu1 %v436_v14  ;;  %v49_v21 = vld [vmem:[%s1853_s0 + $0xb8] sm:$0xff]  ;;  %v35_v22 = vld [vmem:[%s1853_s0 + $0x48] sm:$0xff]  ;;  %v50_v23 = vld [vmem:[%s1853_s0 + $0xc0] sm:$0xff] }
   0x9   :  { %1181 = vmatprep.mubr.msk.f32.mxu1 %vm67_vm0, %v44_v8  ;;  %1203 = vmatpush3.msra.mxu1 %v436_v14  ;;  %v36_v24 = vld [vmem:[%s1853_s0 + $0x50] sm:$0xff]  ;;  %v433_v25 = vld [vmem:[%s1854_s3 + $0x60] sm:$0xff]  ;;  %v51_v26 = vld [vmem:[%s1853_s0 + $0xc8] sm:$0xff] }
   0xa   :  { %1158 = vmatmul.mubr.msk.f32.gmra.mxu0 %vm67_vm0, %v29_v5  ;;  %1204 = vmatprep.subr.mxu1 %v435_v15  ;;  %v37_v27 = vld [vmem:[%s1853_s0 + $0x58] sm:$0xff]  ;;  %v52_v28 = vld [vmem:[%s1853_s0 + $0xd0] sm:$0xff]  ;;  %v38_v29 = vld [vmem:[%s1853_s0 + $0x60] sm:$0xff] }
   0xb   :  { %1160 = vmatprep.mubr.msk.f32.mxu0 %vm67_vm0, %v30_v9  ;;  %1205 = vmatpush3.msra.mxu1 %v435_v15  ;;  %v432_v30 = vld [vmem:[%s1854_s3 + $0x58] sm:$0xff]  ;;  %v39_v32 = vld [vmem:[%s1853_s0 + $0x68] sm:$0xff]  ;;  %v54_v33 = vld [vmem:[%s1853_s0 + $0xe0] sm:$0xff] }
   0xc   :  { %1182 = vmatmul.mubr.msk.f32.gmra.mxu1 %vm67_vm0, %v45_v10  ;;  %1206 = vmatprep.subr.mxu1 %v434_v20  ;;  %v53_v31 = vld [vmem:[%s1853_s0 + $0xd8] sm:$0xff]  ;;  %v40_v34 = vld [vmem:[%s1853_s0 + $0x70] sm:$0xff]  ;;  %v55_v36 = vld [vmem:[%s1853_s0 + $0xe8] sm:$0xff] }
   0xd   :  { %1184 = vmatprep.mubr.msk.f32.mxu1 %vm67_vm0, %v46_v12  ;;  %1207 = vmatpush3.msra.mxu1 %v434_v20  ;;  %v431_v35 = vld [vmem:[%s1854_s3 + $0x50] sm:$0xff]  ;;  %v41_v37 = vld [vmem:[%s1853_s0 + $0x78] sm:$0xff]  ;;  %v430_v39 = vld [vmem:[%s1854_s3 + $0x48] sm:$0xff] }
   0xe   :  { %1161 = vmatmul.mubr.msk.f32.gmra.mxu0 %vm67_vm0, %v31_v11  ;;  %1208 = vmatprep.subr.mxu1 %v433_v25  ;;  %v56_v38 = vld [vmem:[%s1853_s0 + $0xf0] sm:$0xff]  ;;  %v57_v40 = vld [vmem:[%s1853_s0 + $0xf8] sm:$0xff]  ;;  %v429_v41 = vld [vmem:[%s1854_s3 + $0x40] sm:$0xff] }
   0xf   :  { %1163 = vmatprep.mubr.msk.f32.mxu0 %vm67_vm0, %v32_v13  ;;  %1209 = vmatpush3.msra.mxu1 %v433_v25  ;;  %v428_v42 = vld [vmem:[%s1854_s3 + $0x38] sm:$0xff]  ;;  %v427_v43 = vld [vmem:[%s1854_s3 + $0x30] sm:$0xff]  ;;  %v426_v44 = vld [vmem:[%s1854_s3 + $0x28] sm:$0xff] }
  0x10   :  { %1185 = vmatmul.mubr.msk.f32.gmra.mxu1 %vm67_vm0, %v47_v16  ;;  %1210 = vmatprep.subr.mxu1 %v432_v30  ;;  %v425_v45 = vld [vmem:[%s1854_s3 + $0x20] sm:$0xff]  ;;  %v424_v46 = vld [vmem:[%s1854_s3 + $0x18] sm:$0xff]  ;;  %v423_v47 = vld [vmem:[%s1854_s3 + $0x10] sm:$0xff] }
  0x11   :  { %1187 = vmatprep.mubr.msk.f32.mxu1 %vm67_vm0, %v48_v18  ;;  %1211 = vmatpush3.msra.mxu1 %v432_v30  ;;  %v422_v48 = vld [vmem:[%s1854_s3 + $0x8] sm:$0xff]  ;;  %v421_v49 = vld [vmem:[%s1854_s3] sm:$0xff]  ;;  %v716_v50 = vld [vmem:[%s1855_s5 + $0x78] sm:$0xff] }
  0x12   :  { %1164 = vmatmul.mubr.msk.f32.gmra.mxu0 %vm67_vm0, %v33_v17  ;;  %1212 = vmatprep.subr.mxu1 %v431_v35  ;;  %v715_v51 = vld [vmem:[%s1855_s5 + $0x70] sm:$0xff]  ;;  %v714_v52 = vld [vmem:[%s1855_s5 + $0x68] sm:$0xff]  ;;  %v713_v53 = vld [vmem:[%s1855_s5 + $0x60] sm:$0xff] }
  0x13   :  { %1166 = vmatprep.mubr.msk.f32.mxu0 %vm67_vm0, %v34_v19  ;;  %1213 = vmatpush3.msra.mxu1 %v431_v35  ;;  %v712_v54 = vld [vmem:[%s1855_s5 + $0x58] sm:$0xff]  ;;  %v711_v55 = vld [vmem:[%s1855_s5 + $0x50] sm:$0xff]  ;;  %v710_v56 = vld [vmem:[%s1855_s5 + $0x48] sm:$0xff] }
  0x14   :  { %1188 = vmatmul.mubr.msk.f32.gmra.mxu1 %vm67_vm0, %v49_v21  ;;  %1214 = vmatprep.subr.mxu1 %v430_v39  ;;  %v709_v57 = vld [vmem:[%s1855_s5 + $0x40] sm:$0xff]  ;;  %v708_v58 = vld [vmem:[%s1855_s5 + $0x38] sm:$0xff]  ;;  %v707_v59 = vld [vmem:[%s1855_s5 + $0x30] sm:$0xff] }
  0x15   :  { %1190 = vmatprep.mubr.msk.f32.mxu1 %vm67_vm0, %v50_v23  ;;  %1215 = vmatpush3.msra.mxu1 %v430_v39  ;;  %v706_v60 = vld [vmem:[%s1855_s5 + $0x28] sm:$0xff]  ;;  %v705_v61 = vld [vmem:[%s1855_s5 + $0x20] sm:$0xff]  ;;  %v704_v62 = vld [vmem:[%s1855_s5 + $0x18] sm:$0xff] }
  0x16   :  { %1167 = vmatmul.mubr.msk.f32.gmra.mxu0 %vm67_vm0, %v35_v22  ;;  %1216 = vmatprep.subr.mxu1 %v429_v41  ;;  %v1630_v63 = vld [vmem:[%s1856_s2] ss:$0 sm:$0xff] }
  0x17   :  { %1169 = vmatprep.mubr.msk.f32.mxu0 %vm67_vm0, %v36_v24  ;;  %1217 = vmatpush3.msra.mxu1 %v429_v41 }
  0x18   :  { %1191 = vmatmul.mubr.msk.f32.gmra.mxu1 %vm67_vm0, %v51_v26  ;;  %1218 = vmatprep.subr.mxu1 %v428_v42 }
  0x19   :  { %1193 = vmatprep.mubr.msk.f32.mxu1 %vm67_vm0, %v52_v28  ;;  %1219 = vmatpush3.msra.mxu1 %v428_v42 }
  0x1a   :  { %1170 = vmatmul.mubr.msk.f32.gmra.mxu0 %vm67_vm0, %v37_v27  ;;  %1220 = vmatprep.subr.mxu1 %v427_v43 }
  0x1b   :  { %1172 = vmatprep.mubr.msk.f32.mxu0 %vm67_vm0, %v38_v29  ;;  %1221 = vmatpush3.msra.mxu1 %v427_v43 }
  0x1c   :  { %1194 = vmatmul.mubr.msk.f32.gmra.mxu1 %vm67_vm0, %v53_v31  ;;  %1222 = vmatprep.subr.mxu1 %v426_v44 }
  0x1d   :  { %1196 = vmatprep.mubr.msk.f32.mxu1 %vm67_vm0, %v54_v33  ;;  %1223 = vmatpush3.msra.mxu1 %v426_v44 }
  0x1e   :  { %1173 = vmatmul.mubr.msk.f32.gmra.mxu0 %vm67_vm0, %v39_v32  ;;  %1224 = vmatprep.subr.mxu1 %v425_v45 }
  0x1f   :  { %1175 = vmatprep.mubr.msk.f32.mxu0 %vm67_vm0, %v40_v34  ;;  %1225 = vmatpush3.msra.mxu1 %v425_v45 }
  0x20   :  { %1197 = vmatmul.mubr.msk.f32.gmra.mxu1 %vm67_vm0, %v55_v36  ;;  %1226 = vmatprep.subr.mxu1 %v424_v46 }
  0x21   :  { %1199 = vmatprep.mubr.msk.f32.mxu1 %vm67_vm0, %v56_v38  ;;  %1227 = vmatpush3.msra.mxu1 %v424_v46 }
  0x22   :  { %1176 = vmatmul.mubr.msk.f32.gmra.mxu0 %vm67_vm0, %v41_v37  ;;  %1228 = vmatprep.subr.mxu1 %v423_v47 }
  0x23   :  { %1229 = vmatpush3.msra.mxu1 %v423_v47  ;;  %1282 = vmatprep.subr.mxu0 %v716_v50 }
  0x24   :  { %1200 = vmatmul.mubr.msk.f32.gmra.mxu1 %vm67_vm0, %v57_v40  ;;  %1230 = vmatprep.subr.mxu1 %v422_v48 }
  0x25   :  { %1231 = vmatpush3.msra.mxu1 %v422_v48  ;;  %1283 = vmatpush3.msra.mxu0 %v716_v50 }
  0x26   :  { %1232 = vmatprep.subr.mxu1 %v421_v49  ;;  %1284 = vmatprep.subr.mxu0 %v715_v51 }
  0x27   :  { %1233 = vmatpush3.msra.mxu1 %v421_v49  ;;  %1285 = vmatpush3.msra.mxu0 %v715_v51 }
  0x28   :  { %1286 = vmatprep.subr.mxu0 %v714_v52 }
  0x29   :  { %1287 = vmatpush3.msra.mxu0 %v714_v52 }
  0x2a   :  { %1288 = vmatprep.subr.mxu0 %v713_v53 }
  0x2b   :  { %1289 = vmatpush3.msra.mxu0 %v713_v53 }
  0x2c   :  { %1290 = vmatprep.subr.mxu0 %v712_v54 }
  0x2d   :  { %1291 = vmatpush3.msra.mxu0 %v712_v54 }
  0x2e   :  { %1292 = vmatprep.subr.mxu0 %v711_v55 }
  0x2f   :  { %1293 = vmatpush3.msra.mxu0 %v711_v55 }
  0x30   :  { %1294 = vmatprep.subr.mxu0 %v710_v56 }
  0x31   :  { %1295 = vmatpush3.msra.mxu0 %v710_v56 }
  0x32   :  { %1296 = vmatprep.subr.mxu0 %v709_v57 }
  0x33   :  { %1297 = vmatpush3.msra.mxu0 %v709_v57 }
  0x34   :  { %1298 = vmatprep.subr.mxu0 %v708_v58 }
  0x35   :  { %1299 = vmatpush3.msra.mxu0 %v708_v58 }
  0x36   :  { %1300 = vmatprep.subr.mxu0 %v707_v59 }
  0x37   :  { %1301 = vmatpush3.msra.mxu0 %v707_v59 }
  0x38   :  { %1302 = vmatprep.subr.mxu0 %v706_v60 }
  0x39   :  { %1303 = vmatpush3.msra.mxu0 %v706_v60 }
  0x3a   :  { %1304 = vmatprep.subr.mxu0 %v705_v61 }
  0x3b   :  { %1305 = vmatpush3.msra.mxu0 %v705_v61 }
  0x3c   :  { %1306 = vmatprep.subr.mxu0 %v704_v62 }
  0x3d   :  { %1307 = vmatpush3.msra.mxu0 %v704_v62 }
  0xc6   :  { %v1156_v0 = vpop.f32.mrf.mxu0 }
  0xc7   :  { %v236_v1 = vadd.f32 %v1156_v0, %v1630_v63 }
  0xc8   :  { %v230_v2 = vpop.f32.mrf.mxu0  ;;  %v1634_v4 = vpop.f32.mrf.mxu1 }
  0xc9   :  { %v231_v3 = vadd.f32 %v1630_v63, %v230_v2  ;;  %v390_v8 = vmax.f32 %v236_v1, 0.0  ;;  %v316_v61 = vadd.f32 %v1634_v4, %v1630_v63 }
  0xca   :  { %v1159_v5 = vpop.f32.mrf.mxu0  ;;  %v310_v7 = vpop.f32.mrf.mxu1 }
  0xcb   :  { %v389_v6 = vmax.f32 %v231_v3, 0.0  ;;  %v246_v9 = vadd.f32 %v1159_v5, %v1630_v63  ;;  %v311_v51 = vadd.f32 %v1630_v63, %v310_v7  ;;  %v406_v2 = vmax.f32 %v316_v61, 0.0 }
  0xcc   :  { %v240_v10 = vpop.f32.mrf.mxu0  ;;  %v1638_v12 = vpop.f32.mrf.mxu1 }
  0xcd   :  { %v241_v11 = vadd.f32 %v1630_v63, %v240_v10  ;;  %1234 = vmatprep.mubr.f32.mxu1 %v389_v6  ;;  %v392_v16 = vmax.f32 %v246_v9, 0.0  ;;  %v405_v58 = vmax.f32 %v311_v51, 0.0  ;;  %v326_v3 = vadd.f32 %v1638_v12, %v1630_v63 }
  0xce   :  { %v1162_v13 = vpop.f32.mrf.mxu0  ;;  %1235 = vmatmul.mubr.f32.vlgmr.msra.gmra.mxu1 %v390_v8  ;;  %v320_v15 = vpop.f32.mrf.mxu1 }
  0xcf   :  { %v391_v14 = vmax.f32 %v241_v11, 0.0  ;;  %v256_v17 = vadd.f32 %v1162_v13, %v1630_v63  ;;  %v321_v59 = vadd.f32 %v1630_v63, %v320_v15  ;;  %v408_v8 = vmax.f32 %v326_v3, 0.0 }
  0xd0   :  { %v250_v18 = vpop.f32.mrf.mxu0  ;;  %v1642_v20 = vpop.f32.mrf.mxu1 }
  0xd1   :  { %v251_v19 = vadd.f32 %v1630_v63, %v250_v18  ;;  %1237 = vmatprep.mubr.f32.mxu1 %v391_v14  ;;  %v394_v23 = vmax.f32 %v256_v17, 0.0  ;;  %v407_v0 = vmax.f32 %v321_v59, 0.0  ;;  %v336_v4 = vadd.f32 %v1642_v20, %v1630_v63 }
  0xd2   :  { %v1165_v21 = vpop.f32.mrf.mxu0  ;;  %1238 = vmatmul.mubr.f32.gmra.mxu1 %v392_v16  ;;  %v330_v26 = vpop.f32.mrf.mxu1 }
  0xd3   :  { %v393_v22 = vmax.f32 %v251_v19, 0.0  ;;  %v266_v24 = vadd.f32 %v1165_v21, %v1630_v63  ;;  %v331_v1 = vadd.f32 %v1630_v63, %v330_v26  ;;  %v410_v13 = vmax.f32 %v336_v4, 0.0 }
  0xd4   :  { %v260_v25 = vpop.f32.mrf.mxu0  ;;  %v1189_v33 = vpop.f32.mrf.mxu1 }
  0xd5   :  { %v261_v27 = vadd.f32 %v1630_v63, %v260_v25  ;;  %1240 = vmatprep.mubr.f32.mxu1 %v393_v22  ;;  %v396_v30 = vmax.f32 %v266_v24, 0.0  ;;  %v409_v6 = vmax.f32 %v331_v1, 0.0  ;;  %v346_v14 = vadd.f32 %v1189_v33, %v1630_v63  ;;  %v703_v33 = vld [vmem:[%s1855_s5 + $0x10] sm:$0xff] }
  0xd6   :  { %v1168_v28 = vpop.f32.mrf.mxu0  ;;  %1241 = vmatmul.mubr.f32.gmra.mxu1 %v394_v23  ;;  %v340_v40 = vpop.f32.mrf.mxu1  ;;  %1308 = vmatprep.subr.mxu0 %v703_v33 }
  0xd7   :  { %v395_v29 = vmax.f32 %v261_v27, 0.0  ;;  %v276_v31 = vadd.f32 %v1168_v28, %v1630_v63  ;;  %v341_v7 = vadd.f32 %v1630_v63, %v340_v40  ;;  %v412_v17 = vmax.f32 %v346_v14, 0.0  ;;  %1309 = vmatpush3.msra.mxu0 %v703_v33 }
  0xd8   :  { %v270_v32 = vpop.f32.mrf.mxu0  ;;  %v1192_v47 = vpop.f32.mrf.mxu1 }
  0xd9   :  { %v271_v34 = vadd.f32 %v1630_v63, %v270_v32  ;;  %1243 = vmatprep.mubr.f32.mxu1 %v395_v29  ;;  %v398_v37 = vmax.f32 %v276_v31, 0.0  ;;  %v411_v10 = vmax.f32 %v341_v7, 0.0  ;;  %v356_v18 = vadd.f32 %v1192_v47, %v1630_v63 }
  0xda   :  { %v1171_v35 = vpop.f32.mrf.mxu0  ;;  %1244 = vmatmul.mubr.f32.gmra.mxu1 %v396_v30  ;;  %v350_v55 = vpop.f32.mrf.mxu1 }
  0xdb   :  { %v397_v36 = vmax.f32 %v271_v34, 0.0  ;;  %v286_v38 = vadd.f32 %v1171_v35, %v1630_v63  ;;  %v351_v11 = vadd.f32 %v1630_v63, %v350_v55  ;;  %v414_v22 = vmax.f32 %v356_v18, 0.0  ;;  %v702_v34 = vld [vmem:[%s1855_s5 + $0x8] sm:$0xff]  ;;  %v1685_v35 = vld [vmem:[%s1857_s4] ss:$0 sm:$0xff] }
  0xdc   :  { %v280_v39 = vpop.f32.mrf.mxu0  ;;  %v1195_v62 = vpop.f32.mrf.mxu1  ;;  %1310 = vmatprep.subr.mxu0 %v702_v34 }
  0xdd   :  { %v281_v41 = vadd.f32 %v1630_v63, %v280_v39  ;;  %1246 = vmatprep.mubr.f32.mxu1 %v397_v36  ;;  %v400_v44 = vmax.f32 %v286_v38, 0.0  ;;  %v413_v15 = vmax.f32 %v351_v11, 0.0  ;;  %v366_v23 = vadd.f32 %v1195_v62, %v1630_v63  ;;  %1311 = vmatpush3.msra.mxu0 %v702_v34 }
  0xde   :  { %v1174_v42 = vpop.f32.mrf.mxu0  ;;  %1247 = vmatmul.mubr.f32.gmra.mxu1 %v398_v37  ;;  %v360_v5 = vpop.f32.mrf.mxu1 }
  0xdf   :  { %v399_v43 = vmax.f32 %v281_v41, 0.0  ;;  %v296_v45 = vadd.f32 %v1174_v42, %v1630_v63  ;;  %v361_v16 = vadd.f32 %v1630_v63, %v360_v5  ;;  %v416_v27 = vmax.f32 %v366_v23, 0.0 }
  0xe0   :  { %v290_v46 = vpop.f32.mrf.mxu0  ;;  %v1198_v9 = vpop.f32.mrf.mxu1 }
  0xe1   :  { %v291_v48 = vadd.f32 %v1630_v63, %v290_v46  ;;  %1249 = vmatprep.mubr.f32.mxu1 %v399_v43  ;;  %v402_v52 = vmax.f32 %v296_v45, 0.0  ;;  %v415_v20 = vmax.f32 %v361_v16, 0.0  ;;  %v376_v28 = vadd.f32 %v1198_v9, %v1630_v63 }
  0xe2   :  { %v1177_v49 = vpop.f32.mrf.mxu0  ;;  %1250 = vmatmul.mubr.f32.gmra.mxu1 %v400_v44  ;;  %v370_v12 = vpop.f32.mrf.mxu1 }
  0xe3   :  { %v401_v50 = vmax.f32 %v291_v48, 0.0  ;;  %v306_v53 = vadd.f32 %v1177_v49, %v1630_v63  ;;  %v371_v21 = vadd.f32 %v1630_v63, %v370_v12  ;;  %v418_v30 = vmax.f32 %v376_v28, 0.0 }
  0xe4   :  { %v300_v54 = vpop.f32.mrf.mxu0  ;;  %v1201_v19 = vpop.f32.mrf.mxu1 }
  0xe5   :  { %v301_v56 = vadd.f32 %v1630_v63, %v300_v54  ;;  %1252 = vmatprep.mubr.f32.mxu1 %v401_v50  ;;  %v404_v60 = vmax.f32 %v306_v53, 0.0  ;;  %v417_v25 = vmax.f32 %v371_v21, 0.0  ;;  %v386_v31 = vadd.f32 %v1201_v19, %v1630_v63 }
  0xe6   :  { %1253 = vmatmul.mubr.f32.gmra.mxu1 %v402_v52  ;;  %v380_v24 = vpop.f32.mrf.mxu1 }
  0xe7   :  { %v403_v57 = vmax.f32 %v301_v56, 0.0  ;;  %v381_v26 = vadd.f32 %v1630_v63, %v380_v24  ;;  %v420_v32 = vmax.f32 %v386_v31, 0.0  ;;  %v701_v63 = vld [vmem:[%s1855_s5] sm:$0xff] }
  0xe8   :  { %1312 = vmatprep.subr.mxu0 %v701_v63 }
  0xe9   :  { %1255 = vmatprep.mubr.f32.mxu1 %v403_v57  ;;  %v419_v29 = vmax.f32 %v381_v26, 0.0  ;;  %1313 = vmatpush3.msra.mxu0 %v701_v63 }
  0xea   :  { %1256 = vmatmul.mubr.f32.gmra.mxu1 %v404_v60 }
  0xeb   :  { %1258 = vmatprep.mubr.f32.mxu1 %v405_v58 }
  0xee   :  { %1259 = vmatmul.mubr.f32.gmra.mxu1 %v406_v2 }
  0xef   :  { %1261 = vmatprep.mubr.f32.mxu1 %v407_v0 }
  0xf2   :  { %1262 = vmatmul.mubr.f32.gmra.mxu1 %v408_v8 }
  0xf3   :  { %1264 = vmatprep.mubr.f32.mxu1 %v409_v6 }
  0xf6   :  { %1265 = vmatmul.mubr.f32.gmra.mxu1 %v410_v13 }
  0xf7   :  { %1267 = vmatprep.mubr.f32.mxu1 %v411_v10 }
  0xfa   :  { %1268 = vmatmul.mubr.f32.gmra.mxu1 %v412_v17 }
  0xfb   :  { %1270 = vmatprep.mubr.f32.mxu1 %v413_v15 }
  0xfe   :  { %1271 = vmatmul.mubr.f32.gmra.mxu1 %v414_v22 }
  0xff   :  { %1273 = vmatprep.mubr.f32.mxu1 %v415_v20 }
 0x102   :  { %1274 = vmatmul.mubr.f32.gmra.mxu1 %v416_v27 }
 0x103   :  { %1276 = vmatprep.mubr.f32.mxu1 %v417_v25 }
 0x106   :  { %1277 = vmatmul.mubr.f32.gmra.mxu1 %v418_v30 }
 0x107   :  { %1279 = vmatprep.mubr.f32.mxu1 %v419_v29 }
 0x10a   :  { %1280 = vmatmul.mubr.f32.gmra.mxu1 %v420_v32 }
 0x18e   :  { %v1236_v36 = vpop.f32.mrf.mxu1 }
 0x18f   :  { %v516_v37 = vadd.f32 %v1236_v36, %v1685_v35 }
 0x190   :  { %v510_v38 = vpop.f32.mrf.mxu1 }
 0x191   :  { %v511_v39 = vadd.f32 %v1685_v35, %v510_v38  ;;  %v670_v42 = vmax.f32 %v516_v37, 0.0 }
 0x192   :  { %v1239_v40 = vpop.f32.mrf.mxu1 }
 0x193   :  { %v669_v41 = vmax.f32 %v511_v39, 0.0  ;;  %v526_v43 = vadd.f32 %v1239_v40, %v1685_v35 }
 0x194   :  { %v520_v44 = vpop.f32.mrf.mxu1 }
 0x195   :  { %v521_v45 = vadd.f32 %v1685_v35, %v520_v44  ;;  %1314 = vmatprep.mubr.f32.mxu0 %v669_v41  ;;  %v672_v48 = vmax.f32 %v526_v43, 0.0 }
 0x196   :  { %v1242_v46 = vpop.f32.mrf.mxu1  ;;  %1315 = vmatmul.mubr.f32.vlgmr.msra.gmra.mxu0 %v670_v42 }
 0x197   :  { %v671_v47 = vmax.f32 %v521_v45, 0.0  ;;  %v536_v49 = vadd.f32 %v1242_v46, %v1685_v35 }
 0x198   :  { %v530_v50 = vpop.f32.mrf.mxu1 }
 0x199   :  { %v531_v51 = vadd.f32 %v1685_v35, %v530_v50  ;;  %1317 = vmatprep.mubr.f32.mxu0 %v671_v47  ;;  %v674_v54 = vmax.f32 %v536_v49, 0.0 }
 0x19a   :  { %v1245_v52 = vpop.f32.mrf.mxu1  ;;  %1318 = vmatmul.mubr.f32.gmra.mxu0 %v672_v48 }
 0x19b   :  { %v673_v53 = vmax.f32 %v531_v51, 0.0  ;;  %v546_v55 = vadd.f32 %v1245_v52, %v1685_v35 }
 0x19c   :  { %v540_v56 = vpop.f32.mrf.mxu1 }
 0x19d   :  { %v541_v57 = vadd.f32 %v1685_v35, %v540_v56  ;;  %1320 = vmatprep.mubr.f32.mxu0 %v673_v53  ;;  %v676_v60 = vmax.f32 %v546_v55, 0.0 }
 0x19e   :  { %v1248_v58 = vpop.f32.mrf.mxu1  ;;  %1321 = vmatmul.mubr.f32.gmra.mxu0 %v674_v54 }
 0x19f   :  { %v675_v59 = vmax.f32 %v541_v57, 0.0  ;;  %v556_v61 = vadd.f32 %v1248_v58, %v1685_v35 }
 0x1a0   :  { %v550_v62 = vpop.f32.mrf.mxu1 }
 0x1a1   :  { %v551_v0 = vadd.f32 %v1685_v35, %v550_v62  ;;  %1323 = vmatprep.mubr.f32.mxu0 %v675_v59  ;;  %v678_v3 = vmax.f32 %v556_v61, 0.0 }
 0x1a2   :  { %v1251_v1 = vpop.f32.mrf.mxu1  ;;  %1324 = vmatmul.mubr.f32.gmra.mxu0 %v676_v60 }
 0x1a3   :  { %v677_v2 = vmax.f32 %v551_v0, 0.0  ;;  %v566_v5 = vadd.f32 %v1251_v1, %v1685_v35 }
 0x1a4   :  { %v560_v6 = vpop.f32.mrf.mxu1 }
 0x1a5   :  { %v561_v7 = vadd.f32 %v1685_v35, %v560_v6  ;;  %1326 = vmatprep.mubr.f32.mxu0 %v677_v2  ;;  %v680_v9 = vmax.f32 %v566_v5, 0.0 }
 0x1a6   :  { %v1254_v8 = vpop.f32.mrf.mxu1  ;;  %1327 = vmatmul.mubr.f32.gmra.mxu0 %v678_v3 }
 0x1a7   :  { %v679_v4 = vmax.f32 %v561_v7, 0.0  ;;  %v576_v10 = vadd.f32 %v1254_v8, %v1685_v35  ;;  %v1722_v7 = vld [vmem:[%s1858_s6] ss:$0 sm:$0xff] }
 0x1a8   :  { %v570_v11 = vpop.f32.mrf.mxu1 }
 0x1a9   :  { %v571_v13 = vadd.f32 %v1685_v35, %v570_v11  ;;  %1329 = vmatprep.mubr.f32.mxu0 %v679_v4  ;;  %v682_v15 = vmax.f32 %v576_v10, 0.0 }
 0x1aa   :  { %v1257_v14 = vpop.f32.mrf.mxu1  ;;  %1330 = vmatmul.mubr.f32.gmra.mxu0 %v680_v9 }
 0x1ab   :  { %v681_v12 = vmax.f32 %v571_v13, 0.0  ;;  %v586_v16 = vadd.f32 %v1257_v14, %v1685_v35 }
 0x1ac   :  { %v580_v17 = vpop.f32.mrf.mxu1 }
 0x1ad   :  { %v581_v18 = vadd.f32 %v1685_v35, %v580_v17  ;;  %1332 = vmatprep.mubr.f32.mxu0 %v681_v12  ;;  %v684_v21 = vmax.f32 %v586_v16, 0.0 }
 0x1ae   :  { %v1260_v19 = vpop.f32.mrf.mxu1  ;;  %1333 = vmatmul.mubr.f32.gmra.mxu0 %v682_v15 }
 0x1af   :  { %v683_v20 = vmax.f32 %v581_v18, 0.0  ;;  %v596_v22 = vadd.f32 %v1260_v19, %v1685_v35 }
 0x1b0   :  { %v590_v23 = vpop.f32.mrf.mxu1 }
 0x1b1   :  { %v591_v24 = vadd.f32 %v1685_v35, %v590_v23  ;;  %1335 = vmatprep.mubr.f32.mxu0 %v683_v20  ;;  %v686_v27 = vmax.f32 %v596_v22, 0.0 }
 0x1b2   :  { %v1263_v25 = vpop.f32.mrf.mxu1  ;;  %1336 = vmatmul.mubr.f32.gmra.mxu0 %v684_v21 }
 0x1b3   :  { %v685_v26 = vmax.f32 %v591_v24, 0.0  ;;  %v606_v28 = vadd.f32 %v1263_v25, %v1685_v35 }
 0x1b4   :  { %v600_v29 = vpop.f32.mrf.mxu1 }
 0x1b5   :  { %v601_v30 = vadd.f32 %v1685_v35, %v600_v29  ;;  %1338 = vmatprep.mubr.f32.mxu0 %v685_v26  ;;  %v688_v33 = vmax.f32 %v606_v28, 0.0 }
 0x1b6   :  { %v1266_v31 = vpop.f32.mrf.mxu1  ;;  %1339 = vmatmul.mubr.f32.gmra.mxu0 %v686_v27 }
 0x1b7   :  { %v687_v32 = vmax.f32 %v601_v30, 0.0  ;;  %v616_v34 = vadd.f32 %v1266_v31, %v1685_v35 }
 0x1b8   :  { %v610_v63 = vpop.f32.mrf.mxu1 }
 0x1b9   :  { %v611_v36 = vadd.f32 %v1685_v35, %v610_v63  ;;  %1341 = vmatprep.mubr.f32.mxu0 %v687_v32  ;;  %v690_v39 = vmax.f32 %v616_v34, 0.0 }
 0x1ba   :  { %v1269_v37 = vpop.f32.mrf.mxu1  ;;  %1342 = vmatmul.mubr.f32.gmra.mxu0 %v688_v33 }
 0x1bb   :  { %v689_v38 = vmax.f32 %v611_v36, 0.0  ;;  %v626_v40 = vadd.f32 %v1269_v37, %v1685_v35 }
 0x1bc   :  { %v620_v41 = vpop.f32.mrf.mxu1 }
 0x1bd   :  { %v621_v42 = vadd.f32 %v1685_v35, %v620_v41  ;;  %1344 = vmatprep.mubr.f32.mxu0 %v689_v38  ;;  %v692_v45 = vmax.f32 %v626_v40, 0.0 }
 0x1be   :  { %v1272_v43 = vpop.f32.mrf.mxu1  ;;  %1345 = vmatmul.mubr.f32.gmra.mxu0 %v690_v39 }
 0x1bf   :  { %v691_v44 = vmax.f32 %v621_v42, 0.0  ;;  %v636_v46 = vadd.f32 %v1272_v43, %v1685_v35 }
 0x1c0   :  { %v630_v47 = vpop.f32.mrf.mxu1 }
 0x1c1   :  { %v631_v48 = vadd.f32 %v1685_v35, %v630_v47  ;;  %1347 = vmatprep.mubr.f32.mxu0 %v691_v44  ;;  %v694_v51 = vmax.f32 %v636_v46, 0.0 }
 0x1c2   :  { %v1275_v49 = vpop.f32.mrf.mxu1  ;;  %1348 = vmatmul.mubr.f32.gmra.mxu0 %v692_v45 }
 0x1c3   :  { %v693_v50 = vmax.f32 %v631_v48, 0.0  ;;  %v646_v52 = vadd.f32 %v1275_v49, %v1685_v35 }
 0x1c4   :  { %v640_v53 = vpop.f32.mrf.mxu1 }
 0x1c5   :  { %v641_v54 = vadd.f32 %v1685_v35, %v640_v53  ;;  %1350 = vmatprep.mubr.f32.mxu0 %v693_v50  ;;  %v696_v57 = vmax.f32 %v646_v52, 0.0 }
 0x1c6   :  { %v1278_v55 = vpop.f32.mrf.mxu1  ;;  %1351 = vmatmul.mubr.f32.gmra.mxu0 %v694_v51 }
 0x1c7   :  { %v695_v56 = vmax.f32 %v641_v54, 0.0  ;;  %v656_v58 = vadd.f32 %v1278_v55, %v1685_v35 }
 0x1c8   :  { %v650_v59 = vpop.f32.mrf.mxu1 }
 0x1c9   :  { %v651_v60 = vadd.f32 %v1685_v35, %v650_v59  ;;  %1353 = vmatprep.mubr.f32.mxu0 %v695_v56  ;;  %v698_v0 = vmax.f32 %v656_v58, 0.0 }
 0x1ca   :  { %v1281_v61 = vpop.f32.mrf.mxu1  ;;  %1354 = vmatmul.mubr.f32.gmra.mxu0 %v696_v57 }
 0x1cb   :  { %v697_v62 = vmax.f32 %v651_v60, 0.0  ;;  %v666_v1 = vadd.f32 %v1281_v61, %v1685_v35 }
 0x1cc   :  { %v660_v2 = vpop.f32.mrf.mxu1 }
 0x1cd   :  { %v661_v3 = vadd.f32 %v1685_v35, %v660_v2  ;;  %1356 = vmatprep.mubr.f32.mxu0 %v697_v62  ;;  %v700_v6 = vmax.f32 %v666_v1, 0.0 }
 0x1ce   :  { %1357 = vmatmul.mubr.f32.gmra.mxu0 %v698_v0 }
 0x1cf   :  { %v699_v5 = vmax.f32 %v661_v3, 0.0 }
 0x1d1   :  { %1359 = vmatprep.mubr.f32.mxu0 %v699_v5 }
 0x1d2   :  { %1360 = vmatmul.mubr.f32.gmra.mxu0 %v700_v6 }
 0x256   :  { %v1316_v8 = vpop.f32.mrf.mxu0 }
 0x257   :  { %v796_v4 = vadd.f32 %v1316_v8, %v1722_v7 }
 0x258   :  { %v790_v9 = vpop.f32.mrf.mxu0 }
 0x259   :  { %950 = vst [vmem:[%s1859_s7 + $0x8] sm:$0xff] %v796_v4  ;;  %v791_v35 = vadd.f32 %v1722_v7, %v790_v9 }
 0x25a   :  { %v1319_v10 = vpop.f32.mrf.mxu0 }
 0x25b   :  { %949 = vst [vmem:[%s1859_s7] sm:$0xff] %v791_v35  ;;  %v806_v11 = vadd.f32 %v1319_v10, %v1722_v7 }
 0x25c   :  { %v800_v13 = vpop.f32.mrf.mxu0 }
 0x25d   :  { %952 = vst [vmem:[%s1859_s7 + $0x18] sm:$0xff] %v806_v11  ;;  %v801_v14 = vadd.f32 %v1722_v7, %v800_v13 }
 0x25e   :  { %v1322_v12 = vpop.f32.mrf.mxu0 }
 0x25f   :  { %951 = vst [vmem:[%s1859_s7 + $0x10] sm:$0xff] %v801_v14  ;;  %v816_v15 = vadd.f32 %v1322_v12, %v1722_v7 }
 0x260   :  { %v810_v16 = vpop.f32.mrf.mxu0 }
 0x261   :  { %954 = vst [vmem:[%s1859_s7 + $0x28] sm:$0xff] %v816_v15  ;;  %v811_v17 = vadd.f32 %v1722_v7, %v810_v16 }
 0x262   :  { %v1325_v18 = vpop.f32.mrf.mxu0 }
 0x263   :  { %953 = vst [vmem:[%s1859_s7 + $0x20] sm:$0xff] %v811_v17  ;;  %v826_v19 = vadd.f32 %v1325_v18, %v1722_v7 }
 0x264   :  { %v820_v20 = vpop.f32.mrf.mxu0 }
 0x265   :  { %956 = vst [vmem:[%s1859_s7 + $0x38] sm:$0xff] %v826_v19  ;;  %v821_v21 = vadd.f32 %v1722_v7, %v820_v20 }
 0x266   :  { %v1328_v22 = vpop.f32.mrf.mxu0 }
 0x267   :  { %955 = vst [vmem:[%s1859_s7 + $0x30] sm:$0xff] %v821_v21  ;;  %v836_v23 = vadd.f32 %v1328_v22, %v1722_v7 }
 0x268   :  { %v830_v24 = vpop.f32.mrf.mxu0 }
 0x269   :  { %958 = vst [vmem:[%s1859_s7 + $0x48] sm:$0xff] %v836_v23  ;;  %v831_v25 = vadd.f32 %v1722_v7, %v830_v24 }
 0x26a   :  { %v1331_v26 = vpop.f32.mrf.mxu0 }
 0x26b   :  { %957 = vst [vmem:[%s1859_s7 + $0x40] sm:$0xff] %v831_v25  ;;  %v846_v27 = vadd.f32 %v1331_v26, %v1722_v7 }
 0x26c   :  { %v840_v28 = vpop.f32.mrf.mxu0 }
 0x26d   :  { %960 = vst [vmem:[%s1859_s7 + $0x58] sm:$0xff] %v846_v27  ;;  %v841_v29 = vadd.f32 %v1722_v7, %v840_v28 }
 0x26e   :  { %v1334_v30 = vpop.f32.mrf.mxu0 }
 0x26f   :  { %959 = vst [vmem:[%s1859_s7 + $0x50] sm:$0xff] %v841_v29  ;;  %v856_v31 = vadd.f32 %v1334_v30, %v1722_v7 }
 0x270   :  { %v850_v32 = vpop.f32.mrf.mxu0 }
 0x271   :  { %962 = vst [vmem:[%s1859_s7 + $0x68] sm:$0xff] %v856_v31  ;;  %v851_v33 = vadd.f32 %v1722_v7, %v850_v32 }
 0x272   :  { %v1337_v34 = vpop.f32.mrf.mxu0 }
 0x273   :  { %961 = vst [vmem:[%s1859_s7 + $0x60] sm:$0xff] %v851_v33  ;;  %v866_v63 = vadd.f32 %v1337_v34, %v1722_v7 }
 0x274   :  { %v860_v36 = vpop.f32.mrf.mxu0 }
 0x275   :  { %964 = vst [vmem:[%s1859_s7 + $0x78] sm:$0xff] %v866_v63  ;;  %v861_v37 = vadd.f32 %v1722_v7, %v860_v36 }
 0x276   :  { %v1340_v38 = vpop.f32.mrf.mxu0 }
 0x277   :  { %963 = vst [vmem:[%s1859_s7 + $0x70] sm:$0xff] %v861_v37  ;;  %v876_v39 = vadd.f32 %v1340_v38, %v1722_v7 }
 0x278   :  { %v870_v40 = vpop.f32.mrf.mxu0 }
 0x279   :  { %966 = vst [vmem:[%s1859_s7 + $0x88] sm:$0xff] %v876_v39  ;;  %v871_v41 = vadd.f32 %v1722_v7, %v870_v40 }
 0x27a   :  { %v1343_v42 = vpop.f32.mrf.mxu0 }
 0x27b   :  { %965 = vst [vmem:[%s1859_s7 + $0x80] sm:$0xff] %v871_v41  ;;  %v886_v43 = vadd.f32 %v1343_v42, %v1722_v7 }
 0x27c   :  { %v880_v44 = vpop.f32.mrf.mxu0 }
 0x27d   :  { %968 = vst [vmem:[%s1859_s7 + $0x98] sm:$0xff] %v886_v43  ;;  %v881_v45 = vadd.f32 %v1722_v7, %v880_v44 }
 0x27e   :  { %v1346_v46 = vpop.f32.mrf.mxu0 }
 0x27f   :  { %967 = vst [vmem:[%s1859_s7 + $0x90] sm:$0xff] %v881_v45  ;;  %v896_v47 = vadd.f32 %v1346_v46, %v1722_v7 }
 0x280   :  { %v890_v48 = vpop.f32.mrf.mxu0 }
 0x281   :  { %970 = vst [vmem:[%s1859_s7 + $0xa8] sm:$0xff] %v896_v47  ;;  %v891_v49 = vadd.f32 %v1722_v7, %v890_v48 }
 0x282   :  { %v1349_v50 = vpop.f32.mrf.mxu0 }
 0x283   :  { %969 = vst [vmem:[%s1859_s7 + $0xa0] sm:$0xff] %v891_v49  ;;  %v906_v51 = vadd.f32 %v1349_v50, %v1722_v7 }
 0x284   :  { %v900_v52 = vpop.f32.mrf.mxu0 }
 0x285   :  { %972 = vst [vmem:[%s1859_s7 + $0xb8] sm:$0xff] %v906_v51  ;;  %v901_v53 = vadd.f32 %v1722_v7, %v900_v52 }
 0x286   :  { %v1352_v54 = vpop.f32.mrf.mxu0 }
 0x287   :  { %971 = vst [vmem:[%s1859_s7 + $0xb0] sm:$0xff] %v901_v53  ;;  %v916_v55 = vadd.f32 %v1352_v54, %v1722_v7 }
 0x288   :  { %v910_v56 = vpop.f32.mrf.mxu0 }
 0x289   :  { %974 = vst [vmem:[%s1859_s7 + $0xc8] sm:$0xff] %v916_v55  ;;  %v911_v57 = vadd.f32 %v1722_v7, %v910_v56 }
 0x28a   :  { %v1355_v58 = vpop.f32.mrf.mxu0 }
 0x28b   :  { %973 = vst [vmem:[%s1859_s7 + $0xc0] sm:$0xff] %v911_v57  ;;  %v926_v59 = vadd.f32 %v1355_v58, %v1722_v7 }
 0x28c   :  { %v920_v60 = vpop.f32.mrf.mxu0 }
 0x28d   :  { %976 = vst [vmem:[%s1859_s7 + $0xd8] sm:$0xff] %v926_v59  ;;  %v921_v61 = vadd.f32 %v1722_v7, %v920_v60 }
 0x28e   :  { %v1358_v62 = vpop.f32.mrf.mxu0 }
 0x28f   :  { %975 = vst [vmem:[%s1859_s7 + $0xd0] sm:$0xff] %v921_v61  ;;  %v936_v0 = vadd.f32 %v1358_v62, %v1722_v7 }
 0x290   :  { %v930_v1 = vpop.f32.mrf.mxu0 }
 0x291   :  { %978 = vst [vmem:[%s1859_s7 + $0xe8] sm:$0xff] %v936_v0  ;;  %v931_v2 = vadd.f32 %v1722_v7, %v930_v1 }
 0x292   :  { %v1361_v3 = vpop.f32.mrf.mxu0 }
 0x293   :  { %977 = vst [vmem:[%s1859_s7 + $0xe0] sm:$0xff] %v931_v2  ;;  %v946_v5 = vadd.f32 %v1361_v3, %v1722_v7 }
 0x294   :  { %v940_v6 = vpop.f32.mrf.mxu0 }
 0x295   :  { %980 = vst [vmem:[%s1859_s7 + $0xf8] sm:$0xff] %v946_v5  ;;  %v941_v8 = vadd.f32 %v1722_v7, %v940_v6 }
 0x297   :  { %979 = vst [vmem:[%s1859_s7 + $0xf0] sm:$0xff] %v941_v8 }

</bundles_post_ra>
